<compile_context>
chip_gen: v5e
topology: v5e:2x2
jax: 0.10.0
libtpu: 0.0.40
codegen_flags: <defaults>
</compile_context>

<pallas_src>
import numpy as np
import jax
import jax.numpy as jnp
from jax.experimental import pallas as pl
from jax.experimental.pallas import tpu as pltpu


def _round_up(x, m):
    return ((x + m - 1) // m) * m


# ----------------------------- Pallas kernels ------------------------------

def _mm_bias_relu_kernel(p_ref, w_ref, b_ref, o_ref, acc_ref):
    """out = relu(p @ w + b); K-tiled with an f32 VMEM accumulator."""
    @pl.when(pl.program_id(2) == 0)
    def _():
        acc_ref[...] = jnp.zeros_like(acc_ref)

    acc_ref[...] += jnp.dot(p_ref[...], w_ref[...],
                            preferred_element_type=jnp.float32)

    @pl.when(pl.program_id(2) == pl.num_programs(2) - 1)
    def _():
        o_ref[...] = jnp.maximum(acc_ref[...] + b_ref[...], 0.0).astype(o_ref.dtype)


def _mm_bias_residual_relu_kernel(p_ref, w_ref, b_ref, sc_ref, o_ref, acc_ref):
    """out = relu(p @ w + b + shortcut); identity-shortcut variant."""
    @pl.when(pl.program_id(2) == 0)
    def _():
        acc_ref[...] = jnp.zeros_like(acc_ref)

    acc_ref[...] += jnp.dot(p_ref[...], w_ref[...],
                            preferred_element_type=jnp.float32)

    @pl.when(pl.program_id(2) == pl.num_programs(2) - 1)
    def _():
        o_ref[...] = jnp.maximum(
            acc_ref[...] + b_ref[...] + sc_ref[...].astype(jnp.float32),
            0.0).astype(o_ref.dtype)


def fused_conv_matmul(patches, w_cols, bias, shortcut=None,
                      *, tn=128, out_dtype=jnp.float32):
    """relu(patches @ w_cols + bias [+ shortcut]) via a tiled pallas_call.

    patches : (M, K)        -- im2col patch rows (cast to bf16 for the MXU)
    w_cols  : (K, Cout)     -- BN-scale-folded weight columns
    bias    : (Cout,)       -- folded BN bias
    shortcut: (M, Cout)|None-- residual added before ReLU (f32)
    """
    M, K = patches.shape
    Kw, Cout = w_cols.shape
    assert K == Kw

    # Tile sizes: lane-dense (multiples of 128 on lane dims), VMEM-friendly
    # even under v7x's 64 MiB VMEM (worst case working set ~1-2 MiB).
    tm = 256 if M > 256 else _round_up(M, 8)
    tk = 512 if K >= 512 else _round_up(K, 128)
    Mp = _round_up(M, tm)
    Kp = _round_up(K, tk)
    Np = _round_up(Cout, tn)

    # Zero-pad + cast the MXU operands to bf16 (f32 accumulate in-kernel).
    p = jnp.pad(patches.astype(jnp.bfloat16), ((0, Mp - M), (0, Kp - K)))
    w = jnp.pad(w_cols, ((0, Kp - K), (0, Np - Cout))).astype(jnp.bfloat16)
    b = jnp.pad(bias.reshape(1, -1).astype(jnp.float32),
                ((0, 0), (0, Np - Cout)))

    grid = (Mp // tm, Np // tn, Kp // tk)
    in_specs = [
        pl.BlockSpec((tm, tk), lambda i, j, k: (i, k)),   # patch tile
        pl.BlockSpec((tk, tn), lambda i, j, k: (k, j)),   # weight tile
        pl.BlockSpec((1, tn), lambda i, j, k: (0, j)),    # bias row
    ]
    args = [p, w, b]

    if shortcut is None:
        kernel = _mm_bias_relu_kernel
    else:
        sc = jnp.pad(shortcut.astype(jnp.float32),
                     ((0, Mp - M), (0, Np - Cout)))
        in_specs.append(pl.BlockSpec((tm, tn), lambda i, j, k: (i, j)))
        args.append(sc)
        kernel = _mm_bias_residual_relu_kernel

    out = pl.pallas_call(
        kernel,
        out_shape=jax.ShapeDtypeStruct((Mp, Np), out_dtype),
        grid_spec=pltpu.PrefetchScalarGridSpec(
            num_scalar_prefetch=0,
            grid=grid,
            in_specs=in_specs,
            out_specs=pl.BlockSpec((tm, tn), lambda i, j, k: (i, j)),
            scratch_shapes=[pltpu.VMEM((tm, tn), jnp.float32)],
        ),
        compiler_params=pltpu.CompilerParams(
            dimension_semantics=("parallel", "parallel", "arbitrary"),
            vmem_limit_bytes=32 * 1024 * 1024,
        ),
    )(*args)
    return out[:M, :Cout]


# ------------------------------ JAX glue ------------------------------------

def im2col(x_nhwc, k, stride, pad):
    """x: (N,H,W,C) -> patches (N*Ho*Wo, k*k*C), plus (Ho, Wo)."""
    N, H, W, C = x_nhwc.shape
    xp = jnp.pad(x_nhwc, ((0, 0), (pad, pad), (pad, pad), (0, 0)))
    Ho = (H + 2 * pad - k) // stride + 1
    Wo = (W + 2 * pad - k) // stride + 1
    slabs = []
    for i in range(k):
        for j in range(k):
            slabs.append(xp[:, i:i + stride * Ho:stride, j:j + stride * Wo:stride, :])
    p = jnp.stack(slabs, axis=3)                     # (N,Ho,Wo,k*k,C)
    return p.reshape(N * Ho * Wo, k * k * C), Ho, Wo


def conv_bn_to_matmul(w_oihw, gamma, beta, mean, var, eps=1e-5):
    """Fold inference-mode BN into the conv weight columns.

    Returns (w_cols, bias): (kh*kw*Cin, Cout) with the BN scale pre-multiplied
    per output channel, and the remaining per-channel bias.
    """
    scale = gamma / jnp.sqrt(var + eps)              # (Cout,)
    bias = beta - mean * scale                       # (Cout,)
    Cout, Cin, kh, kw = w_oihw.shape
    w_cols = jnp.transpose(w_oihw, (2, 3, 1, 0)).reshape(kh * kw * Cin, Cout)
    return w_cols * scale[None, :], bias


# ------------------------------ BasicBlock ----------------------------------

def init_basic_block(key, in_planes, planes, stride):
    ks = jax.random.split(key, 4)

    def conv_w(k, shape):
        fan_in = shape[1] * shape[2] * shape[3]
        bound = 1.0 / np.sqrt(fan_in)
        return jax.random.uniform(k, shape, jnp.float32, -bound, bound)

    def bn_params(k):
        kg, kb, km, kv = jax.random.split(k, 4)
        g = 1.0 + 0.1 * jax.random.normal(kg, (planes,), jnp.float32)
        b = 0.1 * jax.random.normal(kb, (planes,), jnp.float32)
        m = 0.05 * jax.random.normal(km, (planes,), jnp.float32)
        v = 1.0 + 0.1 * jax.random.uniform(kv, (planes,), jnp.float32)
        return g, b, m, v

    k1, k2, k3, k4 = jax.random.split(ks[0], 4)
    params = {
        "w1": conv_w(k1, (planes, in_planes, 3, 3)),
        "bn1": bn_params(ks[1]),
        "w2": conv_w(k2, (planes, planes, 3, 3)),
        "bn2": bn_params(ks[2]),
    }
    has_proj = (stride != 1) or (in_planes != planes)
    if has_proj:
        params["w_sc"] = conv_w(k3, (planes, in_planes, 1, 1))
        params["bn_sc"] = bn_params(ks[3])
    return params, has_proj


def basic_block_forward(x_nchw, params, has_proj, stride):
    x = jnp.transpose(x_nchw, (0, 2, 3, 1)).astype(jnp.float32)   # NCHW -> NHWC
    N, H, W, Cin = x.shape
    planes = params["w1"].shape[0]

    # bf16 stream for the patch matrices (halves the im2col HBM traffic).
    x_bf = x.astype(jnp.bfloat16)

    # ---- conv1 + bn1 + relu (fused Pallas matmul) ----
    p1, Ho, Wo = im2col(x_bf, k=3, stride=stride, pad=1)
    w1, b1 = conv_bn_to_matmul(params["w1"], *params["bn1"])
    out1_flat = fused_conv_matmul(p1, w1, b1)
    out1 = out1_flat.reshape(N, Ho, Wo, planes)

    # ---- conv2 + bn2 + shortcut + relu (fused Pallas matmul) ----
    p2, _, _ = im2col(out1.astype(jnp.bfloat16), k=3, stride=1, pad=1)
    w2, b2 = conv_bn_to_matmul(params["w2"], *params["bn2"])

    M = N * Ho * Wo
    if has_proj:
        # Fuse the 1x1 stride-s projection into the main matmul: the
        # projection patches are just strided spatial samples of x, so we
        # concatenate along K and add the folded biases.
        sp = x_bf[:, ::stride, ::stride, :].reshape(M, Cin)
        wsc, bsc = conv_bn_to_matmul(params["w_sc"], *params["bn_sc"])
        p_cat = jnp.concatenate([p2, sp], axis=1)
        w_cat = jnp.concatenate([w2, wsc], axis=0)
        out_flat = fused_conv_matmul(p_cat, w_cat, b2 + bsc)
    else:
        # Identity shortcut (requires Cin == planes, stride == 1): fused
        # residual add + ReLU inside the kernel.
        sc = x.reshape(M, Cin)
        out_flat = fused_conv_matmul(p2, w2, b2, shortcut=sc)

    out = out_flat.reshape(N, Ho, Wo, planes)
    return jnp.transpose(out, (0, 3, 1, 2))           # NHWC -> NCHW


# ------------------------------ reference -----------------------------------

def _conv_ref(x_nhwc, w_oihw, stride, pad):
    w_hwio = jnp.transpose(w_oihw, (2, 3, 1, 0))
    return jax.lax.conv_general_dilated(
        x_nhwc, w_hwio, (stride, stride), ((pad, pad), (pad, pad)),
        dimension_numbers=("NHWC", "HWIO", "NHWC"))


def _fold_bn_ref(gamma, beta, mean, var, eps=1e-5):
    scale = gamma / jnp.sqrt(var + eps)
    return scale.reshape(1, -1), (beta - mean * scale).reshape(1, -1)


def basic_block_ref(x_nchw, params, has_proj, stride):
    x = jnp.transpose(x_nchw, (0, 2, 3, 1))
    s1, b1 = _fold_bn_ref(*params["bn1"])
    s2, b2 = _fold_bn_ref(*params["bn2"])
    out = _conv_ref(x, params["w1"], stride, 1) * s1 + b1
    out = jax.nn.relu(out)
    out = _conv_ref(out, params["w2"], 1, 1) * s2 + b2
    if has_proj:
        ssc, bsc = _fold_bn_ref(*params["bn_sc"])
        sc = _conv_ref(x, params["w_sc"], stride, 0) * ssc + bsc
    else:
        sc = x
    out = jax.nn.relu(out + sc)
    return jnp.transpose(out, (0, 3, 1, 2))


# --------------------------------- main --------------------------------------

if __name__ == "__main__":
    key = jax.random.PRNGKey(0)
    kx1, kp1, kx2, kp2 = jax.random.split(key, 4)

    # Case 1: projection shortcut (stride=2, channel expansion 4 -> 8).
    x1 = jax.random.normal(kx1, (2, 4, 16, 16), jnp.float32)
    params1, proj1 = init_basic_block(kp1, 4, 8, 2)
    out1 = jax.block_until_ready(basic_block_forward(x1, params1, proj1, 2))
    ref1 = jax.block_until_ready(basic_block_ref(x1, params1, proj1, 2))
    np.testing.assert_allclose(np.asarray(out1), np.asarray(ref1),
                               rtol=3e-2, atol=3e-2)  # bf16 MXU operands

    # Case 2: identity shortcut (stride=1, 8 -> 8).
    x2 = jax.random.normal(kx2, (2, 8, 16, 16), jnp.float32)
    params2, proj2 = init_basic_block(kp2, 8, 8, 1)
    out2 = jax.block_until_ready(basic_block_forward(x2, params2, proj2, 1))
    ref2 = jax.block_until_ready(basic_block_ref(x2, params2, proj2, 1))
    np.testing.assert_allclose(np.asarray(out2), np.asarray(ref2),
                               rtol=3e-2, atol=3e-2)

    print("KERNEL_OK")
</pallas_src>

<mosaic_0001>
module attributes {stable_mosaic.version = 11 : i64} {
  func.func @_mm_bias_relu_kernel(%arg0: i32, %arg1: i32, %arg2: i32, %arg3: memref<128x128xbf16, #tpu.memory_space<vmem>>, %arg4: memref<128x128xbf16, #tpu.memory_space<vmem>>, %arg5: memref<1x128xf32, #tpu.memory_space<vmem>>, %arg6: memref<128x128xf32, #tpu.memory_space<vmem>>, %arg7: memref<128x128xf32, #tpu.memory_space<vmem>>) attributes {dimension_semantics = [#tpu.dimension_semantics<parallel>, #tpu.dimension_semantics<parallel>, #tpu.dimension_semantics<arbitrary>], iteration_bounds = array<i64: 1, 1, 1>, scalar_prefetch = 0 : i64, scratch_operands = 1 : i64, tpu.core_type = #tpu.core_type<tc>, window_params = [{transform_indices = @transform_0, window_bounds = array<i64: 128, 128>}, {transform_indices = @transform_1, window_bounds = array<i64: 128, 128>}, {transform_indices = @transform_2, window_bounds = array<i64: 1, 128>}, {transform_indices = @transform_3, window_bounds = array<i64: 128, 128>}]} {
    %c0_i32 = arith.constant 0 : i32
    %0 = arith.cmpi eq, %arg2, %c0_i32 : i32
    %1 = arith.extui %0 : i1 to i32
    %c0_i32_0 = arith.constant 0 : i32
    %2 = arith.cmpi ne, %1, %c0_i32_0 : i32
    scf.if %2 {
      %cst_10 = arith.constant 0.000000e+00 : f32
      %12 = vector.broadcast %cst_10 : f32 to vector<128x128xf32>
      %c0_11 = arith.constant 0 : index
      %c0_12 = arith.constant 0 : index
      %13 = vector.load %arg7[%c0_11, %c0_12] : memref<128x128xf32, #tpu.memory_space<vmem>>, vector<128x128xf32>
      tpu.vector_store %arg7[%c0_11, %c0_12], %12 {strides = array<i32>} : memref<128x128xf32, #tpu.memory_space<vmem>>, vector<128x128xf32>,
    } else {
    }
    %c0 = arith.constant 0 : index
    %c0_1 = arith.constant 0 : index
    %3 = vector.load %arg7[%c0, %c0_1] : memref<128x128xf32, #tpu.memory_space<vmem>>, vector<128x128xf32>
    %c0_2 = arith.constant 0 : index
    %c0_3 = arith.constant 0 : index
    %4 = vector.load %arg3[%c0_2, %c0_3] : memref<128x128xbf16, #tpu.memory_space<vmem>>, vector<128x128xbf16>
    %c0_4 = arith.constant 0 : index
    %c0_5 = arith.constant 0 : index
    %5 = vector.load %arg4[%c0_4, %c0_5] : memref<128x128xbf16, #tpu.memory_space<vmem>>, vector<128x128xbf16>
    %cst = arith.constant dense<0.000000e+00> : vector<128x128xf32>
    %6 = tpu.matmul %4, %5, %cst {dimension_numbers = #tpu.dot_dimension_numbers<[1], [0], [0], [1], [0, 0, 1, 1], [], []>} : vector<128x128xbf16>, vector<128x128xbf16>, vector<128x128xf32> -> vector<128x128xf32>
    %7 = arith.addf %3, %6 : vector<128x128xf32>
    %c0_6 = arith.constant 0 : index
    %c0_7 = arith.constant 0 : index
    %8 = vector.load %arg7[%c0_6, %c0_7] : memref<128x128xf32, #tpu.memory_space<vmem>>, vector<128x128xf32>
    tpu.vector_store %arg7[%c0_6, %c0_7], %7 {strides = array<i32>} : memref<128x128xf32, #tpu.memory_space<vmem>>, vector<128x128xf32>,
    %c0_i32_8 = arith.constant 0 : i32
    %9 = arith.cmpi eq, %arg2, %c0_i32_8 : i32
    %10 = arith.extui %9 : i1 to i32
    %c0_i32_9 = arith.constant 0 : i32
    %11 = arith.cmpi ne, %10, %c0_i32_9 : i32
    scf.if %11 {
      %c0_10 = arith.constant 0 : index
      %c0_11 = arith.constant 0 : index
      %12 = vector.load %arg7[%c0_10, %c0_11] : memref<128x128xf32, #tpu.memory_space<vmem>>, vector<128x128xf32>
      %c0_12 = arith.constant 0 : index
      %c0_13 = arith.constant 0 : index
      %13 = vector.load %arg5[%c0_12, %c0_13] : memref<1x128xf32, #tpu.memory_space<vmem>>, vector<1x128xf32>
      %14 = vector.broadcast %13 : vector<1x128xf32> to vector<128x128xf32>
      %15 = arith.addf %12, %14 : vector<128x128xf32>
      %cst_14 = arith.constant 0.000000e+00 : f32
      %16 = vector.broadcast %cst_14 : f32 to vector<128x128xf32>
      %17 = arith.maximumf %15, %16 : vector<128x128xf32>
      %c0_15 = arith.constant 0 : index
      %c0_16 = arith.constant 0 : index
      %18 = vector.load %arg6[%c0_15, %c0_16] : memref<128x128xf32, #tpu.memory_space<vmem>>, vector<128x128xf32>
      tpu.vector_store %arg6[%c0_15, %c0_16], %17 {strides = array<i32>} : memref<128x128xf32, #tpu.memory_space<vmem>>, vector<128x128xf32>,
    } else {
    }
    return
  }
  func.func @transform_0(%arg0: i32, %arg1: i32, %arg2: i32) -> (i32, i32) {
    %c0_i32 = arith.constant 0 : i32
    return %arg0, %arg2 : i32, i32
  }
  func.func @transform_1(%arg0: i32, %arg1: i32, %arg2: i32) -> (i32, i32) {
    %c0_i32 = arith.constant 0 : i32
    return %arg2, %arg1 : i32, i32
  }
  func.func @transform_2(%arg0: i32, %arg1: i32, %arg2: i32) -> (i32, i32) {
    %c0_i32 = arith.constant 0 : i32
    %c0_i32_0 = arith.constant 0 : i32
    return %c0_i32, %arg1 : i32, i32
  }
  func.func @transform_3(%arg0: i32, %arg1: i32, %arg2: i32) -> (i32, i32) {
    %c0_i32 = arith.constant 0 : i32
    return %arg0, %arg1 : i32, i32
  }
}

</mosaic_0001>

<bundles_post_ra>
// kernel: tpu_custom_call.1
= control target key start
LH: loop header
LB: loop body
LE: loop exit
PB: predicated region body
PF: predicated region fallthrough
CT: control target
= control target key end

     0   :  { %8 = vsyncpa [#allocation4], 0  ;;  %s630_s0 = inlined_call_operand.hbm [shape: bf16[128,128], index: 0, kind: input, shape index: {}]   ;;  %s631_s1 = inlined_call_operand.hbm [shape: bf16[128,128], index: 1, kind: input, shape index: {}]   ;;  %s632_s2 = inlined_call_operand.vmem [shape: f32[1,128], index: 2, kind: input, shape index: {}]   ;;  %s633_s3 = inlined_call_operand.hbm [shape: f32[128,128], index: 3, kind: output, shape index: {}]  }
   0x1   :  { %9 = vsyncpa [#allocation7], 0 }
   0x2   :  { %10 = vsyncpa [#allocation5], 0  ;;  %s15_s14 = sshll.u32 %s630_s0, 4  ;;  %s573_s15 = smov [#allocation3]   ;;  %s16_s14 = int_to_ptr.hbm [resolvable:$true] %s15_s14 }
   0x3   :  { %s17_s16 = sshll.u32 %s573_s15, 4  ;;  %s28_s19 = sshll.u32 %s631_s1, 4  ;;  %s18_s16 = int_to_ptr.vmem [resolvable:$true] %s17_s16  ;;  %s29_s19 = int_to_ptr.hbm [resolvable:$true] %s28_s19 }
   0x4   :  { %s574_s20 = smov 64   ;;  %s575_s21 = smov 4  }
   0x5   :  { %23 = dma.hbm_to_vmem [thread:$0]  %s16_s14, 1024, %s18_s16, [#allocation4], %s574_s20, %s574_s20, %s575_s21  }
   0x6   :  { %s576_s22 = smov [#allocation6]  }
   0x7   :  { %s30_s23 = sshll.u32 %s576_s22, 4  ;;  %s31_s23 = int_to_ptr.vmem [resolvable:$true] %s30_s23 }
   0x8   :  { %36 = dma.hbm_to_vmem [thread:$0]  %s29_s19, 1024, %s31_s23, [#allocation7], %s574_s20, %s574_s20, %s575_s21  }
   0x9   :  { %567 = dma.done.wait [#allocation4], 1024  }
   0xa   :  { %568 = vsyncadd [#allocation4], 4294966272 }
   0xb   :  { %569 = dma.done.wait [#allocation7], 1024  }
   0xc   :  { %570 = vsyncadd [#allocation7], 4294966272  ;;  %v462_v0 = vld [vmem:[#allocation6 + $0x38] sm:$0xff]  ;;  %v461_v1 = vld [vmem:[#allocation6 + $0x30] sm:$0xff]  ;;  %s369_s27 = sshll.u32 %s633_s3, 4  ;;  %s578_s28 = smov 128   ;;  %s370_s27 = int_to_ptr.hbm [resolvable:$true] %s369_s27 }
   0xd   :  { %211 = vmatpush.bf16.msra.mxu0 %v462_v0  ;;  %463 = vmatpush.bf16.msra.mxu1 %v462_v0  ;;  %v460_v2 = vld [vmem:[#allocation6 + $0x28] sm:$0xff]  ;;  %v459_v3 = vld [vmem:[#allocation6 + $0x20] sm:$0xff]  ;;  %v458_v4 = vld [vmem:[#allocation6 + $0x18] sm:$0xff]  ;;  %s579_s29 = smov 8  }
   0xe   :  { %464 = vmatpush.bf16.msra.mxu2 %v462_v0  ;;  %465 = vmatpush.bf16.msra.mxu3 %v462_v0  ;;  %v457_v5 = vld [vmem:[#allocation6 + $0x10] sm:$0xff]  ;;  %v456_v6 = vld [vmem:[#allocation6 + $0x8] sm:$0xff]  ;;  %v455_v7 = vld [vmem:[#allocation6] sm:$0xff] }
   0xf   :  { %v447_v8 = vld [vmem:[#allocation3] sm:$0xff]  ;;  %v449_v9 = vld [vmem:[#allocation3 + $0x10] sm:$0xff]  ;;  %v448_v12 = vld [vmem:[#allocation3 + $0x8] sm:$0xff] }
  0x10   :  { %v451_v10 = vld [vmem:[#allocation3 + $0x20] sm:$0xff]  ;;  %v453_v11 = vld [vmem:[#allocation3 + $0x30] sm:$0xff]  ;;  %v450_v13 = vld [vmem:[#allocation3 + $0x18] sm:$0xff] }
  0x11   :  { %212 = vmatpush.bf16.msra.mxu0 %v461_v1  ;;  %466 = vmatpush.bf16.msra.mxu1 %v461_v1  ;;  %v452_v14 = vld [vmem:[#allocation3 + $0x28] sm:$0xff]  ;;  %v454_v15 = vld [vmem:[#allocation3 + $0x38] sm:$0xff]  ;;  %v609_v16 = vld [vmem:[%s632_s2] ss:$0 sm:$0xff]  ;;  %s577_s2 = smov [#allocation8]  }
  0x12   :  { %467 = vmatpush.bf16.msra.mxu2 %v461_v1  ;;  %468 = vmatpush.bf16.msra.mxu3 %v461_v1  ;;  %s367_s24 = sshll.u32 %s577_s2, 4  ;;  %s368_s24 = int_to_ptr.vmem [resolvable:$true] %s367_s24 }
  0x15   :  { %213 = vmatpush.bf16.msra.mxu0 %v460_v2  ;;  %469 = vmatpush.bf16.msra.mxu1 %v460_v2 }
  0x16   :  { %470 = vmatpush.bf16.msra.mxu2 %v460_v2  ;;  %471 = vmatpush.bf16.msra.mxu3 %v460_v2 }
  0x19   :  { %214 = vmatpush.bf16.msra.mxu0 %v459_v3  ;;  %472 = vmatpush.bf16.msra.mxu1 %v459_v3 }
  0x1a   :  { %473 = vmatpush.bf16.msra.mxu2 %v459_v3  ;;  %474 = vmatpush.bf16.msra.mxu3 %v459_v3 }
  0x1d   :  { %215 = vmatpush.bf16.msra.mxu0 %v458_v4  ;;  %475 = vmatpush.bf16.msra.mxu1 %v458_v4 }
  0x1e   :  { %476 = vmatpush.bf16.msra.mxu2 %v458_v4  ;;  %477 = vmatpush.bf16.msra.mxu3 %v458_v4 }
  0x21   :  { %216 = vmatpush.bf16.msra.mxu0 %v457_v5  ;;  %478 = vmatpush.bf16.msra.mxu1 %v457_v5 }
  0x22   :  { %479 = vmatpush.bf16.msra.mxu2 %v457_v5  ;;  %480 = vmatpush.bf16.msra.mxu3 %v457_v5 }
  0x25   :  { %217 = vmatpush.bf16.msra.mxu0 %v456_v6  ;;  %481 = vmatpush.bf16.msra.mxu1 %v456_v6 }
  0x26   :  { %482 = vmatpush.bf16.msra.mxu2 %v456_v6  ;;  %483 = vmatpush.bf16.msra.mxu3 %v456_v6 }
  0x29   :  { %218 = vmatpush.bf16.msra.mxu0 %v455_v7  ;;  %484 = vmatpush.bf16.msra.mxu1 %v455_v7 }
  0x2a   :  { %485 = vmatpush.bf16.msra.mxu2 %v455_v7  ;;  %486 = vmatpush.bf16.msra.mxu3 %v455_v7 }
  0x2c   :  { %219 = vmatmul.bf16.vlgmr.msra.gmra.mxu0 %v447_v8  ;;  %229 = vmatmul.bf16.vlgmr.msra.gmra.mxu1 %v449_v9 }
  0x2d   :  { %239 = vmatmul.bf16.vlgmr.msra.gmra.mxu2 %v451_v10  ;;  %249 = vmatmul.bf16.vlgmr.msra.gmra.mxu3 %v453_v11 }
  0x3c   :  { %224 = vmatmul.bf16.gmra.mxu0 %v448_v12  ;;  %234 = vmatmul.bf16.gmra.mxu1 %v450_v13 }
  0x3d   :  { %244 = vmatmul.bf16.gmra.mxu2 %v452_v14  ;;  %254 = vmatmul.bf16.gmra.mxu3 %v454_v15 }
  0xa9   :  { %v220_v17 = vpop.f32.mrf.mxu0  ;;  %v230_v18 = vpop.f32.mrf.mxu1 }
  0xaa   :  { %v315_v19 = vadd.f32 %v609_v16, %v220_v17  ;;  %v319_v20 = vadd.f32 %v609_v16, %v230_v18 }
  0xac   :  { %v331_v21 = vmax.f32 %v315_v19, 0.0  ;;  %v335_v22 = vmax.f32 %v319_v20, 0.0 }
  0xae   :  { %347 = vst [vmem:[#allocation8] sm:$0xff] %v331_v21 }
  0xaf   :  { %351 = vst [vmem:[#allocation8 + $0x20] sm:$0xff] %v335_v22 }
  0xb0   :  { %v240_v23 = vpop.f32.mrf.mxu2  ;;  %v250_v24 = vpop.f32.mrf.mxu3 }
  0xb1   :  { %v323_v25 = vadd.f32 %v609_v16, %v240_v23  ;;  %v327_v26 = vadd.f32 %v609_v16, %v250_v24  ;;  %v222_v27 = vpop.f32.mrf.mxu0  ;;  %v232_v28 = vpop.f32.mrf.mxu1 }
  0xb2   :  { %v316_v29 = vadd.f32 %v609_v16, %v222_v27  ;;  %v320_v30 = vadd.f32 %v609_v16, %v232_v28 }
  0xb3   :  { %v339_v31 = vmax.f32 %v323_v25, 0.0  ;;  %v343_v32 = vmax.f32 %v327_v26, 0.0 }
  0xb4   :  { %v332_v33 = vmax.f32 %v316_v29, 0.0  ;;  %v336_v34 = vmax.f32 %v320_v30, 0.0 }
  0xb5   :  { %355 = vst [vmem:[#allocation8 + $0x40] sm:$0xff] %v339_v31 }
  0xb6   :  { %359 = vst [vmem:[#allocation8 + $0x60] sm:$0xff] %v343_v32 }
  0xb7   :  { %348 = vst [vmem:[#allocation8 + $0x8] sm:$0xff] %v332_v33 }
  0xb8   :  { %352 = vst [vmem:[#allocation8 + $0x28] sm:$0xff] %v336_v34  ;;  %v242_v35 = vpop.f32.mrf.mxu2  ;;  %v252_v36 = vpop.f32.mrf.mxu3 }
  0xb9   :  { %v324_v37 = vadd.f32 %v609_v16, %v242_v35  ;;  %v328_v38 = vadd.f32 %v609_v16, %v252_v36  ;;  %v225_v39 = vpop.f32.mrf.mxu0  ;;  %v235_v40 = vpop.f32.mrf.mxu1 }
  0xba   :  { %v317_v41 = vadd.f32 %v609_v16, %v225_v39  ;;  %v321_v42 = vadd.f32 %v609_v16, %v235_v40 }
  0xbb   :  { %v340_v43 = vmax.f32 %v324_v37, 0.0  ;;  %v344_v44 = vmax.f32 %v328_v38, 0.0 }
  0xbc   :  { %v333_v45 = vmax.f32 %v317_v41, 0.0  ;;  %v337_v46 = vmax.f32 %v321_v42, 0.0 }
  0xbd   :  { %356 = vst [vmem:[#allocation8 + $0x48] sm:$0xff] %v340_v43 }
  0xbe   :  { %360 = vst [vmem:[#allocation8 + $0x68] sm:$0xff] %v344_v44 }
  0xbf   :  { %349 = vst [vmem:[#allocation8 + $0x10] sm:$0xff] %v333_v45 }
  0xc0   :  { %353 = vst [vmem:[#allocation8 + $0x30] sm:$0xff] %v337_v46  ;;  %v245_v47 = vpop.f32.mrf.mxu2  ;;  %v255_v48 = vpop.f32.mrf.mxu3 }
  0xc1   :  { %v325_v49 = vadd.f32 %v609_v16, %v245_v47  ;;  %v329_v50 = vadd.f32 %v609_v16, %v255_v48  ;;  %v227_v51 = vpop.f32.mrf.mxu0  ;;  %v237_v52 = vpop.f32.mrf.mxu1 }
  0xc2   :  { %v318_v53 = vadd.f32 %v609_v16, %v227_v51  ;;  %v322_v54 = vadd.f32 %v609_v16, %v237_v52 }
  0xc3   :  { %v341_v55 = vmax.f32 %v325_v49, 0.0  ;;  %v345_v56 = vmax.f32 %v329_v50, 0.0 }
  0xc4   :  { %v334_v57 = vmax.f32 %v318_v53, 0.0  ;;  %v338_v58 = vmax.f32 %v322_v54, 0.0 }
  0xc5   :  { %357 = vst [vmem:[#allocation8 + $0x50] sm:$0xff] %v341_v55 }
  0xc6   :  { %361 = vst [vmem:[#allocation8 + $0x70] sm:$0xff] %v345_v56 }
  0xc7   :  { %350 = vst [vmem:[#allocation8 + $0x18] sm:$0xff] %v334_v57 }
  0xc8   :  { %354 = vst [vmem:[#allocation8 + $0x38] sm:$0xff] %v338_v58  ;;  %v247_v59 = vpop.f32.mrf.mxu2  ;;  %v257_v60 = vpop.f32.mrf.mxu3 }
  0xc9   :  { %v326_v61 = vadd.f32 %v609_v16, %v247_v59  ;;  %v330_v62 = vadd.f32 %v609_v16, %v257_v60 }
  0xcb   :  { %v342_v63 = vmax.f32 %v326_v61, 0.0  ;;  %v346_v0 = vmax.f32 %v330_v62, 0.0 }
  0xcd   :  { %358 = vst [vmem:[#allocation8 + $0x58] sm:$0xff] %v342_v63 }
  0xce   :  { %362 = vst [vmem:[#allocation8 + $0x78] sm:$0xff] %v346_v0 }
  0xcf   :  { %375 = dma.vmem_to_hbm [thread:$0]  %s368_s24, 2048, %s370_s27, [#allocation5], %s578_s28, %s578_s28, %s579_s29  }
  0xd0   :  { %571 = dma.done.wait [#allocation5], 2048  }
  0xd1   :  { %572 = vsyncadd [#allocation5], 4294965248 }
  0xd2   :  { %380 = vsyncpa [#allocation4], 1 }
  0xd3   :  { %381 = vsyncpa [#allocation7], 1 }
  0xd4   :  { %382 = vsyncpa [#allocation5], 1 }

</bundles_post_ra>
